<compile_context>
chip_gen: v6e
topology: v6e:2x2x1
jax: 0.10.0
libtpu: 0.0.40
codegen_flags: <defaults>
</compile_context>

<pallas_src>
import functools

import jax
import jax.numpy as jnp
from jax.experimental import pallas as pl
from jax.experimental.pallas import tpu as pltpu


def _round_up(x, m):
    return ((x + m - 1) // m) * m


def _ce_kernel(tgt_ref, inp_ref, ws_ref, wb_ref, out_ref, *, s_valid):
    # Blocks are (1, C, TR, 128): lanes = flattened-spatial minor, sublanes =
    # spatial rows, C = vreg-batch dim -> class reductions are pure VPU adds.
    x = inp_ref[...].astype(jnp.float32)          # (1, C, TR, 128) logits
    t = tgt_ref[...].astype(jnp.float32)          # (1, C, TR, 128) soft targets
    ws = ws_ref[...].astype(jnp.float32)          # (1, C, 1, 1) weight*(1-ls)
    wb = wb_ref[...].astype(jnp.float32)          # (1, C, 1, 1) weight*ls/C

    wt = ws * t + wb                              # effective per-class weight*target

    # numerically-stable log-softmax, folded:
    #   -sum_c wt_c*(x_c - m - lse) = (m+lse)*sum_c wt_c - sum_c wt_c*x_c
    m = jnp.max(x, axis=1, keepdims=True)                         # (1,1,TR,128)
    lse = jnp.log(jnp.sum(jnp.exp(x - m), axis=1, keepdims=True))  # (1,1,TR,128)
    loss = (m + lse) * jnp.sum(wt, axis=1, keepdims=True) \
           - jnp.sum(wt * x, axis=1, keepdims=True)               # (1,1,TR,128)

    if s_valid is not None:
        # mask out padded pixels (only when the spatial size was padded)
        tr, tl = x.shape[2], x.shape[3]
        row = jax.lax.broadcasted_iota(jnp.int32, (1, 1, tr, tl), 2)
        lane = jax.lax.broadcasted_iota(jnp.int32, (1, 1, tr, tl), 3)
        idx = (pl.program_id(1) * tr + row) * tl + lane
        loss = jnp.where(idx < s_valid, loss, 0.0)

    # per-tile partial sum, replicated into a tiny (8,128) tile (fused mean)
    ps = jnp.sum(loss, axis=(0, 1, 2, 3), keepdims=True)          # (1,1,1,1)
    out_ref[...] = jnp.broadcast_to(ps, out_ref.shape).astype(jnp.float32)


def cross_entropy_loss(target, _input, weight, *, label_smoothing=0.0,
                       ignore_index=-100, num_samples=50, pred_log_var=None):
    """JAX/Pallas equivalent of atommic CrossEntropyLoss.forward (default path)."""
    del ignore_index, num_samples  # no effect for probability targets / default path
    if pred_log_var is not None:
        # TODO(synk): MC-sampling path not reproducible (torch.randn noise).
        raise NotImplementedError("pred_log_var path not implemented")

    if _input.ndim == 3:
        _input = _input[None]
    if target.ndim == 3:
        target = target[None]

    B, C = int(_input.shape[0]), int(_input.shape[1])
    spatial = _input.shape[2:]
    S = 1
    for d in spatial:
        S *= int(d)

    # flatten spatial dims (free reshape, keeps native dtype -> no extra HBM traffic)
    x = _input.reshape(B, C, S)
    t = target.reshape(B, C, S)

    # tile sizing: ~1 MiB per native-dtype input block -> double-buffered
    # working set of a few MiB, well inside v5e/v6e/v7x scoped VMEM.
    itemsize = jnp.dtype(_input.dtype).itemsize
    target_bytes = 1 << 20
    tr = (target_bytes // (C * 128 * max(itemsize, 1))) // 8 * 8
    tr = max(8, min(tr, 4096))
    ts = tr * 128

    if S <= ts:
        s_pad = _round_up(S, 128)
        r_pad = s_pad // 128
        tr = r_pad          # single spatial tile; block == full dims (always legal)
        n_s = 1
    else:
        s_pad = _round_up(S, ts)
        r_pad = s_pad // 128
        n_s = r_pad // tr

    if s_pad != S:
        # TODO(synk): padding copies the arrays; only hit when the flattened
        # spatial size is not a multiple of the tile (masked out in-kernel).
        x = jnp.pad(x, ((0, 0), (0, 0), (0, s_pad - S)))
        t = jnp.pad(t, ((0, 0), (0, 0), (0, s_pad - S)))

    x = x.reshape(B, C, r_pad, 128)
    t = t.reshape(B, C, r_pad, 128)

    # fold label smoothing into the class weights on the host
    w = jnp.asarray(weight, jnp.float32).reshape(C)
    ls = float(label_smoothing)
    ws = (w * (1.0 - ls)).reshape(1, C, 1, 1)
    wb = (w * (ls / C)).reshape(1, C, 1, 1)

    kernel = functools.partial(_ce_kernel,
                               s_valid=(S if s_pad != S else None))

    partial = pl.pallas_call(
        kernel,
        out_shape=jax.ShapeDtypeStruct((B, n_s, 8, 128), jnp.float32),
        grid=(B, n_s),
        in_specs=[
            pl.BlockSpec((1, C, tr, 128), lambda b, s: (b, 0, s, 0)),   # target
            pl.BlockSpec((1, C, tr, 128), lambda b, s: (b, 0, s, 0)),   # logits
            pl.BlockSpec((1, C, 1, 1), lambda b, s: (0, 0, 0, 0)),      # w*(1-ls)
            pl.BlockSpec((1, C, 1, 1), lambda b, s: (0, 0, 0, 0)),      # w*ls/C
        ],
        out_specs=pl.BlockSpec((1, 1, 8, 128), lambda b, s: (b, s, 0, 0)),
        compiler_params=pltpu.CompilerParams(
            dimension_semantics=("parallel", "parallel"),
            vmem_limit_bytes=32 * 1024 * 1024),
    )(t, x, ws, wb)

    # fused-mean finalization: one scalar per grid step, summed in f32
    total = jnp.sum(partial[:, :, 0, 0])
    return total / jnp.float32(B * S)


def _reference(target, _input, weight, label_smoothing=0.0):
    """Pure-JAX reference for validation."""
    x = _input.astype(jnp.float32)
    C = x.shape[1]
    t = target.astype(jnp.float32)
    t = t * (1.0 - label_smoothing) + label_smoothing / C
    logp = jax.nn.log_softmax(x, axis=1)
    w = jnp.asarray(weight, jnp.float32).reshape((1, C) + (1,) * (x.ndim - 2))
    return jnp.mean(-jnp.sum(w * t * logp, axis=1))


if __name__ == "__main__":
    key = jax.random.PRNGKey(0)
    k1, k2, k3, k4 = jax.random.split(key, 4)

    # --- test 1: f32, batch of 4D inputs -------------------------------------
    B, C, H, W = 2, 4, 16, 16
    logits = jax.random.normal(k1, (B, C, H, W), dtype=jnp.float32)
    target = jax.nn.softmax(
        jax.random.normal(k2, (B, C, H, W), jnp.float32) * 2.0, axis=1)
    weight = jnp.array([0.5, 1.0, 1.5, 2.0], dtype=jnp.float32)
    label_smoothing = 0.1

    loss = cross_entropy_loss(target, logits, weight,
                              label_smoothing=label_smoothing)
    loss = jax.block_until_ready(loss)
    ref = _reference(target, logits, weight, label_smoothing)
    assert loss.shape == ()
    assert jnp.allclose(loss, ref, rtol=1e-5, atol=1e-5), (loss, ref)

    # --- test 2: bf16 inputs (native-dtype HBM path, f32 in-kernel compute) ---
    logits_bf = logits.astype(jnp.bfloat16)
    target_bf = target.astype(jnp.bfloat16)
    loss_bf = cross_entropy_loss(target_bf, logits_bf, weight,
                                 label_smoothing=label_smoothing)
    loss_bf = jax.block_until_ready(loss_bf)
    ref_bf = _reference(target_bf.astype(jnp.float32),
                        logits_bf.astype(jnp.float32), weight, label_smoothing)
    assert jnp.allclose(loss_bf, ref_bf, rtol=1e-4, atol=1e-4), (loss_bf, ref_bf)

    # --- test 3: unbatched 3D input, spatial size not lane-aligned (mask path)
    C2, H2, W2 = 3, 10, 10
    logits3 = jax.random.normal(k3, (C2, H2, W2), dtype=jnp.float32)
    target3 = jax.nn.softmax(
        jax.random.normal(k4, (C2, H2, W2), jnp.float32), axis=0)
    weight3 = jnp.array([1.0, 2.0, 0.5], dtype=jnp.float32)
    loss3 = cross_entropy_loss(target3, logits3, weight3, label_smoothing=0.0)
    loss3 = jax.block_until_ready(loss3)
    ref3 = _reference(target3[None], logits3[None], weight3, 0.0)
    assert jnp.allclose(loss3, ref3, rtol=1e-5, atol=1e-5), (loss3, ref3)

    print("KERNEL_OK")
</pallas_src>

<mosaic_0001>
module attributes {stable_mosaic.version = 11 : i64} {
  func.func @_ce_kernel(%arg0: i32, %arg1: i32, %arg2: memref<1x4x2x128xf32, #tpu.memory_space<vmem>>, %arg3: memref<1x4x2x128xf32, #tpu.memory_space<vmem>>, %arg4: memref<1x4x1x1xf32, #tpu.memory_space<vmem>>, %arg5: memref<1x4x1x1xf32, #tpu.memory_space<vmem>>, %arg6: memref<1x1x8x128xf32, #tpu.memory_space<vmem>>) attributes {dimension_semantics = [#tpu.dimension_semantics<parallel>, #tpu.dimension_semantics<parallel>], iteration_bounds = array<i64: 2, 1>, scalar_prefetch = 0 : i64, scratch_operands = 0 : i64, tpu.core_type = #tpu.core_type<tc>, window_params = [{transform_indices = @transform_0, window_bounds = array<i64: 1, 4, 2, 128>}, {transform_indices = @transform_1, window_bounds = array<i64: 1, 4, 2, 128>}, {pipeline_mode = #tpu.pipeline_mode<synchronous>, transform_indices = @transform_2, window_bounds = array<i64: 1, 4, 1, 1>}, {pipeline_mode = #tpu.pipeline_mode<synchronous>, transform_indices = @transform_3, window_bounds = array<i64: 1, 4, 1, 1>}, {transform_indices = @transform_4, window_bounds = array<i64: 1, 1, 8, 128>}]} {
    %c0 = arith.constant 0 : index
    %c0_0 = arith.constant 0 : index
    %c0_1 = arith.constant 0 : index
    %c0_2 = arith.constant 0 : index
    %0 = vector.load %arg3[%c0, %c0_0, %c0_1, %c0_2] : memref<1x4x2x128xf32, #tpu.memory_space<vmem>>, vector<1x4x2x128xf32>
    %c0_3 = arith.constant 0 : index
    %c0_4 = arith.constant 0 : index
    %c0_5 = arith.constant 0 : index
    %c0_6 = arith.constant 0 : index
    %1 = vector.load %arg2[%c0_3, %c0_4, %c0_5, %c0_6] : memref<1x4x2x128xf32, #tpu.memory_space<vmem>>, vector<1x4x2x128xf32>
    %c0_7 = arith.constant 0 : index
    %c0_8 = arith.constant 0 : index
    %c0_9 = arith.constant 0 : index
    %c0_10 = arith.constant 0 : index
    %2 = vector.load %arg4[%c0_7, %c0_8, %c0_9, %c0_10] : memref<1x4x1x1xf32, #tpu.memory_space<vmem>>, vector<1x4x1x1xf32>
    %c0_11 = arith.constant 0 : index
    %c0_12 = arith.constant 0 : index
    %c0_13 = arith.constant 0 : index
    %c0_14 = arith.constant 0 : index
    %3 = vector.load %arg5[%c0_11, %c0_12, %c0_13, %c0_14] : memref<1x4x1x1xf32, #tpu.memory_space<vmem>>, vector<1x4x1x1xf32>
    %4 = vector.broadcast %2 : vector<1x4x1x1xf32> to vector<1x4x2x128xf32>
    %5 = arith.mulf %4, %1 : vector<1x4x2x128xf32>
    %6 = vector.broadcast %3 : vector<1x4x1x1xf32> to vector<1x4x2x128xf32>
    %7 = arith.addf %5, %6 : vector<1x4x2x128xf32>
    %cst = arith.constant dense<0xFF800000> : vector<1x2x128xf32>
    %8 = vector.multi_reduction <maximumf>, %0, %cst [1] : vector<1x4x2x128xf32> to vector<1x2x128xf32>
    %9 = vector.shape_cast %8 : vector<1x2x128xf32> to vector<1x1x2x128xf32>
    %10 = vector.broadcast %9 : vector<1x1x2x128xf32> to vector<1x4x2x128xf32>
    %11 = arith.subf %0, %10 : vector<1x4x2x128xf32>
    %12 = math.exp %11 : vector<1x4x2x128xf32>
    %cst_15 = arith.constant dense<0.000000e+00> : vector<1x2x128xf32>
    %13 = vector.multi_reduction <add>, %12, %cst_15 [1] : vector<1x4x2x128xf32> to vector<1x2x128xf32>
    %14 = vector.shape_cast %13 : vector<1x2x128xf32> to vector<1x1x2x128xf32>
    %15 = math.log %14 : vector<1x1x2x128xf32>
    %16 = arith.addf %9, %15 : vector<1x1x2x128xf32>
    %cst_16 = arith.constant dense<0.000000e+00> : vector<1x2x128xf32>
    %17 = vector.multi_reduction <add>, %7, %cst_16 [1] : vector<1x4x2x128xf32> to vector<1x2x128xf32>
    %18 = vector.shape_cast %17 : vector<1x2x128xf32> to vector<1x1x2x128xf32>
    %19 = arith.mulf %16, %18 : vector<1x1x2x128xf32>
    %20 = arith.mulf %7, %0 : vector<1x4x2x128xf32>
    %cst_17 = arith.constant dense<0.000000e+00> : vector<1x2x128xf32>
    %21 = vector.multi_reduction <add>, %20, %cst_17 [1] : vector<1x4x2x128xf32> to vector<1x2x128xf32>
    %22 = vector.shape_cast %21 : vector<1x2x128xf32> to vector<1x1x2x128xf32>
    %23 = arith.subf %19, %22 : vector<1x1x2x128xf32>
    %24 = vector.shape_cast %23 : vector<1x1x2x128xf32> to vector<1x1x1x2x128xf32>
    %cst_18 = arith.constant dense<0.000000e+00> : vector<1xf32>
    %25 = vector.multi_reduction <add>, %24, %cst_18 [1, 2, 3, 4] : vector<1x1x1x2x128xf32> to vector<1xf32>
    %26 = vector.shape_cast %25 : vector<1xf32> to vector<1x1x1x1x1xf32>
    %27 = vector.extract %26[0, 0, 0, 0, 0] : f32 from vector<1x1x1x1x1xf32>
    %28 = vector.broadcast %27 : f32 to vector<1x1x1x1xf32>
    %29 = vector.shape_cast %28 : vector<1x1x1x1xf32> to vector<1x1x1x1xf32>
    %30 = vector.broadcast %29 : vector<1x1x1x1xf32> to vector<1x1x8x128xf32>
    %c0_19 = arith.constant 0 : index
    %c0_20 = arith.constant 0 : index
    %c0_21 = arith.constant 0 : index
    %c0_22 = arith.constant 0 : index
    %31 = vector.load %arg6[%c0_19, %c0_20, %c0_21, %c0_22] : memref<1x1x8x128xf32, #tpu.memory_space<vmem>>, vector<1x1x8x128xf32>
    tpu.vector_store %arg6[%c0_19, %c0_20, %c0_21, %c0_22], %30 {strides = array<i32>} : memref<1x1x8x128xf32, #tpu.memory_space<vmem>>, vector<1x1x8x128xf32>,
    return
  }
  func.func @transform_0(%arg0: i32, %arg1: i32) -> (i32, i32, i32, i32) {
    %c0_i32 = arith.constant 0 : i32
    %c0_i32_0 = arith.constant 0 : i32
    %c0_i32_1 = arith.constant 0 : i32
    return %arg0, %c0_i32, %arg1, %c0_i32_0 : i32, i32, i32, i32
  }
  func.func @transform_1(%arg0: i32, %arg1: i32) -> (i32, i32, i32, i32) {
    %c0_i32 = arith.constant 0 : i32
    %c0_i32_0 = arith.constant 0 : i32
    %c0_i32_1 = arith.constant 0 : i32
    return %arg0, %c0_i32, %arg1, %c0_i32_0 : i32, i32, i32, i32
  }
  func.func @transform_2(%arg0: i32, %arg1: i32) -> (i32, i32, i32, i32) {
    %c0_i32 = arith.constant 0 : i32
    %c0_i32_0 = arith.constant 0 : i32
    %c0_i32_1 = arith.constant 0 : i32
    %c0_i32_2 = arith.constant 0 : i32
    %c0_i32_3 = arith.constant 0 : i32
    return %c0_i32, %c0_i32_0, %c0_i32_1, %c0_i32_2 : i32, i32, i32, i32
  }
  func.func @transform_3(%arg0: i32, %arg1: i32) -> (i32, i32, i32, i32) {
    %c0_i32 = arith.constant 0 : i32
    %c0_i32_0 = arith.constant 0 : i32
    %c0_i32_1 = arith.constant 0 : i32
    %c0_i32_2 = arith.constant 0 : i32
    %c0_i32_3 = arith.constant 0 : i32
    return %c0_i32, %c0_i32_0, %c0_i32_1, %c0_i32_2 : i32, i32, i32, i32
  }
  func.func @transform_4(%arg0: i32, %arg1: i32) -> (i32, i32, i32, i32) {
    %c0_i32 = arith.constant 0 : i32
    %c0_i32_0 = arith.constant 0 : i32
    %c0_i32_1 = arith.constant 0 : i32
    return %arg0, %arg1, %c0_i32, %c0_i32_0 : i32, i32, i32, i32
  }
}

</mosaic_0001>

<bundles_post_ra>
// kernel: tpu_custom_call.1
= control target key start
LH: loop header
LB: loop body
LE: loop exit
PB: predicated region body
PF: predicated region fallthrough
CT: control target
= control target key end

     0   :  { %s1070_s0 = inlined_call_operand.hbm [shape: f32[2,4,2,128], index: 0, kind: input, shape index: {}]   ;;  %s1071_s1 = inlined_call_operand.hbm [shape: f32[2,4,2,128], index: 1, kind: input, shape index: {}]   ;;  %s1072_s2 = inlined_call_operand.vmem [shape: f32[1,4,1,1], index: 2, kind: input, shape index: {}]   ;;  %s1073_s3 = inlined_call_operand.vmem [shape: f32[1,4,1,1], index: 3, kind: input, shape index: {}]   ;;  %s1074_s4 = inlined_call_operand.hbm [shape: f32[2,1,8,128], index: 4, kind: output, shape index: {}]  }
   0x1   :  { %1076 = sst [smem:[#allocation12_spill]] %s1070_s0 }
   0x2   :  { %9 = vsyncpa [#allocation3], 0 }
   0x3   :  { %11 = vsyncpa [#allocation3 + $0x1], 0 }
   0x4   :  { %12 = vsyncpa [#allocation6], 0 }
   0x5   :  { %14 = vsyncpa [#allocation6 + $0x1], 0 }
   0x6   :  { %15 = vsyncpa [#allocation4], 0 }
   0x7   :  { %17 = vsyncpa [#allocation4 + $0x1], 0  ;;  %s840_s15 = smov 0   ;;  %s842_s16 = smov 0  }
   0x8   :  { %s844_s17 = smov 0   ;;  %s846_s18 = smov 0  }
   0x9   :  { %s848_s19 = smov 0   ;;  %s850_s20 = smov 0  }
   0xa LB: > { %s555_s21 = sadd.s32 4294967295, %s807_s20   ;;  %s556_s22 = sadd.s32 4294967294, %s807_s20   ;;  %s807_s20 = sphi %s850_s20, %s23_s20   ;;  %s803_s19 = sphi %s848_s19, %s1091_s19   ;;  %s799_s18 = sphi %s846_s18, %s1090_s18   ;;  %s795_s17 = sphi %s844_s17, %s1089_s17   ;;  %s791_s16 = sphi %s842_s16, %s1088_s16   ;;  %s787_s15 = sphi %s840_s15, %s1087_s15  }
   0xb   : > { %s35_s23 = sadd.s32 1, %s803_s19  ;;  %s44_s24 = sadd.s32 1, %s795_s17 }
   0xc   : > { %p37_p0 = scmp.ge.s32.totalorder %s35_s23, 2  ;;  %p51_p1 = scmp.ne.s32.totalorder %s795_s17, %s791_s16 }
   0xd   : > { %p52_p2 = scmp.eq.s32.totalorder %s807_s20, 0  ;;  %p57_p3 = scmp.ne.s32.totalorder %s791_s16, %s787_s15 }
   0xe   : > { %s1093_s23 = smov (%p37_p0, %s35_s23), 0  ;;  %p58_p5 = scmp.eq.s32.totalorder %s555_s21, 0 }
   0xf   : > { %1077 = sst [smem:[#allocation11_spill]] %s1093_s23  ;;  %p881_p4 = por %p52_p2, %p51_p1 }
  0x10   : > { %s39_s26 = ssub.s32 %s803_s19, %s1093_s23  ;;  %p153_p6 = scmp.eq.s32.totalorder %s555_s21, 1 }
  0x11   : > { %p42_p7 = scmp.eq.s32.totalorder %s39_s26, 0  ;;  %p887_p8 = por %p58_p5, %p57_p3 }
  0x12   : > { %p891_p9 = por %p153_p6, %p51_p1  ;;  %p159_p10 = scmp.eq.s32.totalorder %s556_s22, 1 }
  0x13   : > { %s896_s29 = scalar_select %p42_p7, %s795_s17, %s44_s24  }
  0x14   : > { %p898_p11 = por %p159_p10, %p57_p3  ;;  %p602_p13 = scmp.lt.s32.totalorder %s807_s20, 2 }
  0x15   : > { %s905_s5 = sand.u32 1, %s795_s17   ;;  %s581_s7 = sshll.u32 %s803_s19, 7 }
  0x16   : > { %s559_s6 = sshll.u32 %s905_s5, 3  ;;  %s1082_s0 = sld [smem:[#allocation12_spill]] }
  0x17   : > { %s189_s11 = scalar_lea.vmem [#allocation2], %s559_s6  ;;  %p918_p0 = pnand %p602_p13, %p881_p4 }
  0x18   : > { %s197_s12 = sshll.u32 %s189_s11, 4  ;;  %p565_p1 = scmp.ge.s32.totalorder %s807_s20, 1  ;;  %s198_s12 = int_to_ptr.vmem [resolvable:$true] %s197_s12 }
  0x19   : > { %s186_s14 = scalar_lea.sflag [#allocation3], %s905_s5  ;;  %p669_p2 = pneg %p918_p0 }
  0x1a   : > { %s680_s21 = scalar_lea.vmem %s198_s12, 128  ;;  %s809_s22 = smov [#allocation2]  }
  0x1b   : > { %p681_p3 = scmp.ne.s32.totalorder %s198_s12, %s680_s21  ;;  %s685_s24 = sshll.u32 %s809_s22, 4  ;;  %s686_s24 = int_to_ptr.vmem [resolvable:$false] %s685_s24 }
  0x1c   : > { %s196_s10 = scalar_lea.hbm %s1082_s0, %s581_s7  ;;  %s687_s25 = scalar_lea.vmem %s686_s24, 256 }
  0x1d   : > { %p683_p5 = pnand %p681_p3, %p669_p2  ;;  %p688_p4 = scmp.lt.s32.totalorder %s198_s12, %s686_s24 }
  0x1e   : > { %p689_p7 = scmp.lt.s32.totalorder %s687_s25, %s680_s21 }
  0x1f   : > { %p684_p6 = pneg %p683_p5 }
  0x20   : > { %p690_p10 = por %p689_p7, %p688_p4 }
  0x22   : > { %p691_p13 = pnand %p690_p10, %p684_p6 }
  0x24   : > { %694 = shalt.err (!%p691_p13)
}
  0x25   : > { %s810_s26 = smov 32   ;;  %s811_s8 = smov 2  }
  0x26   : > { %594 = dma.hbm_to_vmem [thread:$0]  (!%p918_p0), %s196_s10, 128, %s198_s12, %s186_s14, %s810_s26, %s810_s26, %s811_s8  }
  0x27   : > { %p227_p3 = scmp.lt.s32.totalorder %s807_s20, 3  ;;  %s218_s21 = scalar_lea.hbm %s1071_s1, %s581_s7 }
  0x28   : > { %s211_s24 = scalar_lea.vmem [#allocation5], %s559_s6  ;;  %s208_s0 = scalar_lea.sflag [#allocation6], %s905_s5 }
  0x29   : > { %p939_p5 = pnand %p565_p1, %p227_p3  ;;  %s219_s25 = sshll.u32 %s211_s24, 4  ;;  %s220_s25 = int_to_ptr.vmem [resolvable:$true] %s219_s25 }
  0x2a   : > { %s708_s23 = scalar_lea.vmem %s220_s25, 128  ;;  %s812_s10 = smov [#allocation5]  }
  0x2b   : > { %p709_p6 = scmp.ne.s32.totalorder %s220_s25, %s708_s23  ;;  %s713_s12 = sshll.u32 %s812_s10, 4  ;;  %s714_s12 = int_to_ptr.vmem [resolvable:$false] %s713_s12 }
  0x2c   : > { %s715_s7 = scalar_lea.vmem %s714_s12, 256  ;;  %p716_p10 = scmp.lt.s32.totalorder %s220_s25, %s714_s12 }
  0x2d   : > { %p711_p4 = pnand %p709_p6, %p669_p2  ;;  %p717_p1 = scmp.lt.s32.totalorder %s715_s7, %s708_s23 }
  0x2f   : > { %p712_p7 = pneg %p711_p4  ;;  %p718_p13 = por %p717_p1, %p716_p10 }
  0x31   : > { %p719_p3 = pnand %p718_p13, %p712_p7 }
  0x33   : > { %722 = shalt.err (!%p719_p3)
}
  0x34   : > { %597 = dma.hbm_to_vmem [thread:$0]  (!%p918_p0), %s218_s21, 128, %s220_s25, %s208_s0, %s810_s26, %s810_s26, %s811_s8  }
  0x35   : > { %231 = sbr.rel (%p939_p5) target bundleno = 425 (0x1a9), region = 36  ;;  %s954_s5 = sand.u32 (!%p939_p5), 1, %s791_s16  }
  0x36   : > { %s957_s6 = sshll.u32 (!%p939_p5), %s954_s5, 3  ;;  %s234_s14 = scalar_lea.sflag (!%p939_p5), [#allocation3], %s954_s5 }
  0x37   : > { %s961_s23 = scalar_lea.vmem (!%p939_p5), [#allocation2], %s957_s6 }
  0x3a   : > { %774 = dma.done.wait (%p887_p8), %s234_s14, 128  }
  0x3b   : > { %776 = vsyncadd (%p887_p8), %s234_s14, 4294967168  ;;  %s243_s0 = scalar_lea.sflag [#allocation6], %s954_s5  ;;  %s246_s13 = scalar_lea.vmem [#allocation5], %s957_s6 }
  0x3c   : > { %778 = dma.done.wait (%p887_p8), %s243_s0, 128  }
  0x3d   : > { %780 = vsyncadd (%p887_p8), %s243_s0, 4294967168  ;;  %v813_v0 = vmov 0   ;;  %v571_v1 = vld [vmem:[%s1072_s2 + $0x2] ss:$0 sm:$0xff]  ;;  %v569_v2 = vld [vmem:[%s1072_s2] ss:$0 sm:$0xff] }
  0x3e   : > { %656 = vset.pattern.permute.xlu1 %v813_v0  ;;  %655 = vset.pattern.permute.xlu0 %v813_v0  ;;  %v573_v3 = vld [vmem:[%s1073_s3] ss:$0 sm:$0xff]  ;;  %v570_v4 = vld [vmem:[%s1072_s2 + $0x1] ss:$0 sm:$0xff]  ;;  %v572_v5 = vld [vmem:[%s1072_s2 + $0x3] ss:$0 sm:$0xff] }
  0x3f   : > { %321 = vperm.xlu1 %656, %v571_v1   ;;  %313 = vperm.xlu0 %655, %v569_v2   ;;  %v574_v6 = vld [vmem:[%s1073_s3 + $0x1] ss:$0 sm:$0xff]  ;;  %v576_v7 = vld [vmem:[%s1073_s3 + $0x3] ss:$0 sm:$0xff]  ;;  %v575_v8 = vld [vmem:[%s1073_s3 + $0x2] ss:$0 sm:$0xff] }
  0x40   : > { %vm372_vm0 = vcmask 1041408   ;;  %v276_v9 = vld [vmem:[%s246_s13] sm:$0x3]  ;;  %v277_v10 = vld [vmem:[%s246_s13 + $0x2] sm:$0x3]  ;;  %s578_s9 = sshll.u32 %s799_s18, 7 }
  0x41   : > { %v279_v11 = vld [vmem:[%s246_s13 + $0x6] sm:$0x3]  ;;  %v997_v12 = vld [vmem:[%s246_s13 + $0x4] sm:$0x3]  ;;  %v373_v13 = vsel %vm372_vm0, %v276_v9, -inf  ;;  %v374_v14 = vsel %vm372_vm0, %v277_v10, -inf  ;;  %s447_s24 = scalar_lea.hbm %s1074_s4, %s578_s9 }
  0x42   : > { %v376_v15 = vsel %vm372_vm0, %v279_v11, -inf  ;;  %v375_v16 = vsel %vm372_vm0, %v997_v12, -inf  ;;  %v377_v17 = vmax.f32 %v373_v13, %v374_v14  ;;  %v280_v41 = vld [vmem:[%s961_s23] sm:$0x3]  ;;  %v281_v44 = vld [vmem:[%s961_s23 + $0x2] sm:$0x3] }
  0x43   : > { %353 = vperm.xlu1 %656, %v573_v3   ;;  %317 = vperm.xlu0 %655, %v570_v4   ;;  %v378_v18 = vmax.f32 %v375_v16, %v376_v15  ;;  %v282_v46 = vld [vmem:[%s961_s23 + $0x4] sm:$0x3]  ;;  %v283_v50 = vld [vmem:[%s961_s23 + $0x6] sm:$0x3]  ;;  %s275_s23 = scalar_lea.vmem [#allocation7], %s957_s6  ;;  %s435_s27 = scalar_lea.sflag [#allocation4], %s954_s5 }
  0x44   : > { %s449_s13 = sshll.u32 %s275_s23, 4  ;;  %s814_s6 = smov [#allocation7]   ;;  %s1025_s13 = int_to_ptr.vmem [resolvable:$true] %s449_s13 }
  0x45   : > { %v379_v19 = vmax.f32 %v377_v17, %v378_v18  ;;  %s723_s25 = scalar_lea.vmem %s1025_s13, 128  ;;  %s727_s18 = sshll.u32 %s814_s6, 4  ;;  %s728_s18 = int_to_ptr.vmem [resolvable:$false] %s727_s18 }
  0x46   : > { %p724_p8 = scmp.ne.s32.totalorder %s1025_s13, %s723_s25  ;;  %s729_s10 = scalar_lea.vmem %s728_s18, 256 }
  0x47   : > { %325 = vperm.xlu1 %656, %v572_v5   ;;  %357 = vperm.xlu0 %655, %v574_v6   ;;  %v380_v20 = vsub.f32 %v276_v9, %v379_v19  ;;  %v381_v21 = vsub.f32 %v277_v10, %v379_v19  ;;  %v382_v23 = vsub.f32 %v997_v12, %v379_v19  ;;  %p730_p5 = scmp.lt.s32.totalorder %s1025_s13, %s728_s18  ;;  %p731_p6 = scmp.lt.s32.totalorder %s729_s10, %s723_s25 }
  0x48   : > { %v383_v25 = vsub.f32 %v279_v11, %v379_v19  ;;  %p725_p0 = pnand %p724_p8, %p891_p9 }
  0x49   : > { %v384_v22 = vmul.f32 1.442695, %v380_v20  ;;  %v386_v24 = vmul.f32 1.442695, %v381_v21  ;;  %v388_v26 = vmul.f32 1.442695, %v382_v23  ;;  %p732_p4 = por %p731_p6, %p730_p5 }
  0x4a   : > { %v390_v27 = vmul.f32 1.442695, %v383_v25  ;;  %p726_p2 = pneg %p725_p0 }
  0x4b   : > { %365 = vperm.xlu1 %656, %v576_v7   ;;  %361 = vperm.xlu0 %655, %v575_v8   ;;  %657 = vpow2.f32 %v384_v22 }
  0x4c   : > { %659 = vpow2.f32 %v386_v24  ;;  %p733_p7 = pnand %p732_p4, %p726_p2 }
  0x4d   : > { %661 = vpow2.f32 %v388_v26 }
  0x4e   : > { %663 = vpow2.f32 %v390_v27 }
  0x58   : > { %v658_v28 = vpop.eup %657 }
  0x59   : > { %v660_v29 = vpop.eup %659  ;;  %v392_v30 = vsel %vm372_vm0, %v658_v28, 0.0 }
  0x5a   : > { %v393_v31 = vsel %vm372_vm0, %v660_v29, 0.0  ;;  %v662_v32 = vpop.eup %661 }
  0x5b   : > { %v394_v33 = vadd.f32 %v393_v31, %v392_v30  ;;  %v395_v34 = vsel %vm372_vm0, %v662_v32, 0.0  ;;  %v664_v35 = vpop.eup %663 }
  0x5c   : > { %v397_v37 = vsel %vm372_vm0, %v664_v35, 0.0 }
  0x5d   : > { %v396_v36 = vadd.f32 %v395_v34, %v394_v33 }
  0x5f   : > { %v398_v38 = vadd.f32 %v397_v37, %v396_v36 }
  0x61   : > { %665 = vlog2.f32 %v398_v38 }
  0x6e   : > { %v666_v52 = vpop.eup %665 }
  0x6f   : > { %v400_v61 = vmul.f32 0.6931472, %v666_v52 }
  0xba   : > { %v322_v39 = vpop.permute.xlu1 %321  ;;  %v314_v40 = vpop.permute.xlu0 %313 }
  0xbb   : > { %v328_v45 = vmul.f32 %v314_v40, %v280_v41  ;;  %v330_v54 = vmul.f32 %v322_v39, %v282_v46 }
  0xbe   : > { %v354_v42 = vpop.permute.xlu1 %353  ;;  %v318_v43 = vpop.permute.xlu0 %317 }
  0xbf   : > { %v368_v47 = vadd.f32 %v354_v42, %v328_v45  ;;  %v329_v48 = vmul.f32 %v318_v43, %v281_v44 }
  0xc1   : > { %v410_v55 = vmul.f32 %v368_v47, %v276_v9  ;;  %v402_v62 = vsel %vm372_vm0, %v368_v47, 0.0  ;;  %v401_v9 = vadd.f32 %v400_v61, %v379_v19 }
  0xc2   : > { %v326_v49 = vpop.permute.xlu1 %325  ;;  %v358_v51 = vpop.permute.xlu0 %357 }
  0xc3   : > { %v369_v53 = vadd.f32 %v358_v51, %v329_v48  ;;  %v331_v56 = vmul.f32 %v326_v49, %v283_v50  ;;  %v414_v3 = vsel %vm372_vm0, %v410_v55, 0.0 }
  0xc5   : > { %v403_v57 = vsel %vm372_vm0, %v369_v53, 0.0  ;;  %v411_v58 = vmul.f32 %v369_v53, %v277_v10 }
  0xc6   : > { %v366_v59 = vpop.permute.xlu1 %365  ;;  %v362_v60 = vpop.permute.xlu0 %361  ;;  %v404_v2 = vadd.f32 %v403_v57, %v402_v62 }
  0xc7   : > { %v415_v63 = vsel %vm372_vm0, %v411_v58, 0.0  ;;  %v371_v0 = vadd.f32 %v366_v59, %v331_v56  ;;  %v370_v1 = vadd.f32 %v362_v60, %v330_v54 }
  0xc8   : > { %v416_v7 = vadd.f32 %v415_v63, %v414_v3 }
  0xc9   : > { %v413_v4 = vmul.f32 %v371_v0, %v279_v11  ;;  %v405_v5 = vsel %vm372_vm0, %v370_v1, 0.0  ;;  %v412_v6 = vmul.f32 %v370_v1, %v997_v12  ;;  %v407_v10 = vsel %vm372_vm0, %v371_v0, 0.0 }
  0xca   : > { %v406_v8 = vadd.f32 %v405_v5, %v404_v2 }
  0xcb   : > { %v417_v13 = vsel %vm372_vm0, %v412_v6, 0.0  ;;  %v419_v16 = vsel %vm372_vm0, %v413_v4, 0.0 }
  0xcc   : > { %v408_v14 = vadd.f32 %v407_v10, %v406_v8  ;;  %v418_v15 = vadd.f32 %v417_v13, %v416_v7 }
  0xce   : > { %v409_v17 = vmul.f32 %v408_v14, %v401_v9  ;;  %v420_v18 = vadd.f32 %v419_v16, %v418_v15 }
  0xd0   : > { %v421_v11 = vsub.f32 %v409_v17, %v420_v18 }
  0xd2   : > { %v422_v20 = vsel %vm372_vm0, %v421_v11, 0.0 }
  0xd3   : > { %423 = vadd.xlane.f32.xlu0 %v422_v20 }
 0x15c   : > { %v424_v12 = vpop.xlane.xlu0 %423 }
 0x15d   : > { %v425_v21 = vrot.slane %v424_v12, 4 }
 0x15f   : > { %v426_v19 = vadd.f32 %v425_v21, %v424_v12 }
 0x161   : > { %v427_v22 = vrot.slane %v426_v19, 2 }
 0x163   : > { %v428_v23 = vadd.f32 %v427_v22, %v426_v19 }
 0x165   : > { %v429_v24 = vrot.slane %v428_v23, 1 }
 0x167   : > { %v430_v25 = vadd.f32 %v429_v24, %v428_v23 }
 0x169   : > { %583 = vpush %v430_v25 }
 0x19a   : > { %s584_s11 = spop %583 }
 0x19b   : > { %v432_v26 = vstv %s584_s11 }
 0x19c   : > { %433 = vst [vmem:[%s275_s23] sm:$0xff] %v432_v26 }
 0x19d   : > { %736 = shalt.err (!%p733_p7)
}
 0x19e   : > { %s737_s12 = scalar_lea.hbm %s447_s24, 128  ;;  %s741_s14 = scalar_lea.hbm %s1074_s4, 256 }
 0x19f   : > { %p738_p10 = scmp.ne.s32.totalorder %s447_s24, %s737_s12  ;;  %p742_p3 = scmp.lt.s32.totalorder %s447_s24, %s1074_s4 }
 0x1a0   : > { %p743_p8 = scmp.lt.s32.totalorder %s741_s14, %s737_s12 }
 0x1a1   : > { %p739_p1 = pnand %p738_p10, %p891_p9 }
 0x1a2   : > { %p744_p0 = por %p743_p8, %p742_p3 }
 0x1a3   : > { %p740_p13 = pneg %p739_p1 }
 0x1a5   : > { %p745_p12 = pnand %p744_p0, %p740_p13 }
 0x1a7   : > { %748 = shalt.err (!%p745_p12)
}
 0x1a8   : > { %589 = dma.vmem_to_hbm [thread:$0]  (%p891_p9), %s1025_s13, 128, %s447_s24, %s435_s27  }
 0x1a9 PF: > { %s461_s8 = sand.u32 1, %s787_s15   ;;  %p1085_p2 = scmp.ge.s32.totalorder %s807_s20, 2 }
 0x1aa   : > { %s462_s23 = scalar_lea.sflag [#allocation4], %s461_s8 }
 0x1ab   : > { %p599_p5 = pnand %p1085_p2, %p898_p11 }
 0x1ad   : > { %p600_p6 = pneg %p599_p5 }
 0x1af   : > { %782 = dma.done.wait (%p600_p6), %s462_s23, 128  }
 0x1b0   : > { %784 = vsyncadd (%p600_p6), %s462_s23, 4294967168  ;;  %s23_s20 = sadd.s32 1, %s807_s20   ;;  %s1086_s28 = sld [smem:[#allocation11_spill]] }
 0x1b1   : > { %p20_p4 = scmp.ge.s32.totalorder %s23_s20, 4   ;;  %s1087_s15 = smov %s791_s16 }
 0x1b2   : > { %s1088_s16 = smov %s795_s17  ;;  %s1089_s17 = smov %s896_s29 }
 0x1b3   : > { %s1090_s18 = smov %s803_s19  ;;  %22 = sbr.rel (!%p20_p4) target bundleno = 10 (0xa), region = 94 }
 0x1b6   : > { %s1091_s19 = smov %s1086_s28 }
 0x1b8   :  { %467 = vsyncpa [#allocation3], 1 }
 0x1b9   :  { %469 = vsyncpa [#allocation3 + $0x1], 1 }
 0x1ba   :  { %470 = vsyncpa [#allocation6], 1 }
 0x1bb   :  { %472 = vsyncpa [#allocation6 + $0x1], 1 }
 0x1bc   :  { %473 = vsyncpa [#allocation4], 1 }
 0x1bd   :  { %475 = vsyncpa [#allocation4 + $0x1], 1 }

</bundles_post_ra>
